<compile_context>
chip_gen: v5e
topology: v5e:2x2
jax: 0.10.0
libtpu: 0.0.40
codegen_flags: <defaults>
</compile_context>

<pallas_src>
import math

import jax
import jax.numpy as jnp
import numpy as np
from jax.experimental import pallas as pl
from jax.experimental.pallas import tpu as pltpu


def _round_up(x, m):
    return ((x + m - 1) // m) * m


# --------------------------------------------------------------------------
# Kernels
# --------------------------------------------------------------------------
def _fourier_pe_dedup_kernel(x_ref, w_ref, d_ref, out_ref):
    # x_ref:   (TILE, k*M)          lane-packed positions
    # w_ref:   (k*M, k*F_half)      block-diagonal projection weight (VMEM-resident)
    # d_ref:   (k*F_half, k*F_dim)  constant 0/1 repeat-interleave matrix
    # out_ref: (2, TILE, k*F_dim)   [0]=cos, [1]=sin, lane-dense unmasked stores
    proj = jnp.dot(x_ref[...], w_ref[...], preferred_element_type=jnp.float32)
    c = jnp.cos(proj)                     # half-width: one transcendental per
    s = jnp.sin(proj)                     # *unique* output value only
    d = d_ref[...]
    # Exact duplication: every output column is a 1-term sum (coefficient 1.0),
    # so the MXU interleave introduces no rounding error; it rides the vex slot
    # which is otherwise idle in this EUP/HBM-bound kernel.
    out_ref[0] = jnp.dot(c, d, preferred_element_type=jnp.float32).astype(out_ref.dtype)
    out_ref[1] = jnp.dot(s, d, preferred_element_type=jnp.float32).astype(out_ref.dtype)


def _fourier_pe_dup_kernel(x_ref, w_ref, out_ref):
    # Fallback path: column-duplicated weight, cos/sin over duplicated lanes.
    proj = jnp.dot(x_ref[...], w_ref[...], preferred_element_type=jnp.float32)
    out_ref[0] = jnp.cos(proj).astype(out_ref.dtype)
    out_ref[1] = jnp.sin(proj).astype(out_ref.dtype)


# --------------------------------------------------------------------------
# Parameter glue (constant per module — callers can precompute/hoist this)
# --------------------------------------------------------------------------
def _build_tables(wr_weight, k, dedup):
    """Returns (block-diagonal packed weight, interleave matrix or None)."""
    f_half, M = wr_weight.shape
    w_int = wr_weight.T.astype(jnp.float32)             # (M, f_half)
    if not dedup:
        # repeat_interleave commutes with cos/sin -> duplicate weight columns
        w_int = jnp.repeat(w_int, 2, axis=1)             # (M, f_dim)
    cols = w_int.shape[1]
    if k == 1:
        w_blk = w_int
    else:
        # w_blk[j*M+m, j*cols+f] = w_int[m, f]  (block diagonal over k packed rows)
        eye = jnp.eye(k, dtype=jnp.float32)
        w_blk = (eye[:, :, None, None] * w_int[None, None, :, :])   # (k,k,M,cols)
        w_blk = w_blk.transpose(0, 2, 1, 3).reshape(k * M, k * cols)
    d_mat = None
    if dedup:
        # D[p, q] = 1 iff q // 2 == p : lane repeat-interleave as a matmul.
        d_mat = jnp.repeat(jnp.eye(k * f_half, dtype=jnp.float32), 2, axis=1)
    return w_blk, d_mat


# --------------------------------------------------------------------------
# Wrapper
# --------------------------------------------------------------------------
def learnable_fourier_pe(x, wr_weight, *, out_dtype=jnp.float32,
                         dedup_trig=True, tile_rows=None,
                         out_block_bytes=4 << 20):
    """x: (B, N, M) float32; wr_weight: (F_dim//2, M) (nn.Linear weight layout).

    Returns (2, B, 1, N, F_dim) in `out_dtype` (axis 0 = [cos, sin]), matching
    the PyTorch module output. out_dtype=jnp.bfloat16 halves HBM writeback
    (opt-in: breaks 1e-5 tolerance).
    """
    B, N, M = x.shape
    f_half, M_w = wr_weight.shape
    assert M_w == M, (M_w, M)
    f_dim = 2 * f_half
    T = B * N
    out_dtype = np.dtype(out_dtype)

    # ---- lane-packing factor k: pack k logical rows per kernel row ----------
    if dedup_trig:
        # proj width k*f_half must be a 128-multiple (lane-dense trig + stores)
        k = int(np.lcm(f_half, 128)) // f_half
        if k > 16:
            # interleave matmul MACs scale with k; fall back to duplicated path
            dedup_trig = False
    if not dedup_trig:
        k = int(np.lcm(f_dim, 128)) // f_dim
    kM = k * M
    lane_half = k * f_half
    lane_dim = k * f_dim

    w_blk, d_mat = _build_tables(wr_weight, k, dedup_trig)

    # ---- tile selection: ~out_block_bytes per output block ------------------
    Tp = -(-T // k)                                   # packed rows (pre grid pad)
    row_align = 16 if out_dtype.itemsize < 4 else 8   # (16,128)/(8,128) tiling
    if tile_rows is None:
        tile_rows = out_block_bytes // (2 * lane_dim * out_dtype.itemsize)
    tile = max(row_align, (int(tile_rows) // row_align) * row_align)
    tile = min(tile, _round_up(Tp, row_align))
    grid_t = -(-Tp // tile)
    Tp_pad = grid_t * tile

    # ---- pack x; pad rows to a multiple of k*tile (pad sliced off later) ----
    xf = x.astype(jnp.float32).reshape(T, M)
    pad_rows = Tp_pad * k - T
    if pad_rows:
        xf = jnp.pad(xf, ((0, pad_rows), (0, 0)))
    xf = xf.reshape(Tp_pad, kM)                       # contiguous reshape: free

    # ---- cost estimate (actual padded block-diagonal work) ------------------
    w_cols = lane_half if dedup_trig else lane_dim
    flops = 2 * Tp_pad * kM * w_cols
    if dedup_trig:
        flops += 2 * (2 * Tp_pad * lane_half * lane_dim)   # cos + sin interleave
    transcendentals = 2 * Tp_pad * w_cols
    const_bytes = 4 * (w_blk.size + (d_mat.size if dedup_trig else 0))
    cost = pl.CostEstimate(
        flops=int(flops),
        transcendentals=int(transcendentals),
        bytes_accessed=int(4 * Tp_pad * kM + const_bytes
                           + out_dtype.itemsize * 2 * Tp_pad * lane_dim),
    )

    # ---- pallas_call ---------------------------------------------------------
    # Constant index_maps keep the small weight / interleave tables VMEM-resident
    # across grid steps (their default double-buffers cost <0.3 MiB — negligible).
    in_specs = [pl.BlockSpec((tile, kM), lambda i: (i, 0)),
                pl.BlockSpec(tuple(w_blk.shape), lambda i: (0, 0))]
    operands = [xf, w_blk]
    if dedup_trig:
        in_specs.append(pl.BlockSpec(tuple(d_mat.shape), lambda i: (0, 0)))
        operands.append(d_mat)
        kernel = _fourier_pe_dedup_kernel
    else:
        kernel = _fourier_pe_dup_kernel

    # TODO(synk): verify in an xprof profile that the row axis actually splits
    # across v7x's two TensorCores; if not, switch to pltpu.CORE_PARALLEL /
    # pl.core_map over pltpu.create_tensorcore_mesh.
    out = pl.pallas_call(
        kernel,
        out_shape=jax.ShapeDtypeStruct((2, Tp_pad, lane_dim), out_dtype),
        grid_spec=pltpu.PrefetchScalarGridSpec(
            num_scalar_prefetch=0,
            grid=(grid_t,),
            in_specs=in_specs,
            out_specs=pl.BlockSpec((2, tile, lane_dim), lambda i: (0, i, 0)),
        ),
        compiler_params=pltpu.CompilerParams(
            dimension_semantics=("parallel",),
            # Explicit scoped-VMEM budget: covers the ~16 MiB working set at the
            # default 4 MiB output block on every generation (v5e default is
            # only 16 MiB; v7x physical is 64 MiB so 32 MiB is safe there too).
            vmem_limit_bytes=32 * 1024 * 1024,
        ),
        cost_estimate=cost,
    )(*operands)

    # Un-pad + unpack lanes (contiguous reshapes), then PyTorch output layout
    # (2, B, 1, N, F_dim) — the unsqueeze(-3).
    out = out.reshape(2, Tp_pad * k, f_dim)[:, :T, :]
    return out.reshape(2, B, N, f_dim)[:, :, None, :, :]


# --------------------------------------------------------------------------
# Reference + tests
# --------------------------------------------------------------------------
def _reference(x, wr_weight):
    proj = jnp.einsum("bnm,fm->bnf", x, wr_weight)            # (B, N, F/2)
    emb = jnp.stack([jnp.cos(proj), jnp.sin(proj)], axis=0)   # (2, B, N, F/2)
    emb = emb[:, :, None, :, :]                               # unsqueeze(-3)
    return jnp.repeat(emb, 2, axis=-1)                        # (2, B, 1, N, F)


if __name__ == "__main__":
    # Module hyper-params (small, consistent with forward): M=4, F_dim=32, gamma=1.0
    M, F_dim, gamma = 4, 32, 1.0
    B, N = 2, 8

    key = jax.random.PRNGKey(0)
    kx, kw, kx2 = jax.random.split(key, 3)

    # Deterministic param init matching nn.init.normal_(std=gamma**-2).
    wr_weight = (gamma ** -2) * jax.random.normal(kw, (F_dim // 2, M), jnp.float32)
    x = jax.random.normal(kx, (B, N, M), jnp.float32)

    # 1) default path (dedup trig + MXU interleave), single grid step.
    out = jax.block_until_ready(learnable_fourier_pe(x, wr_weight))
    ref = _reference(x, wr_weight)
    assert out.shape == (2, B, 1, N, F_dim), out.shape
    np.testing.assert_allclose(np.asarray(out), np.asarray(ref), rtol=1e-5, atol=1e-5)

    # 2) multi-step grid + row-padding path (T not a multiple of k*tile).
    B2, N2 = 2, 600                       # T=1200, k=8 -> Tp=150, tile=64, grid=3
    x2 = jax.random.normal(kx2, (B2, N2, M), jnp.float32)
    out2 = jax.block_until_ready(learnable_fourier_pe(x2, wr_weight, tile_rows=64))
    ref2 = _reference(x2, wr_weight)
    assert out2.shape == (2, B2, 1, N2, F_dim), out2.shape
    np.testing.assert_allclose(np.asarray(out2), np.asarray(ref2), rtol=1e-5, atol=1e-5)

    # 3) duplicated-weight fallback path.
    out3 = jax.block_until_ready(
        learnable_fourier_pe(x2, wr_weight, dedup_trig=False, tile_rows=128))
    np.testing.assert_allclose(np.asarray(out3), np.asarray(ref2), rtol=1e-5, atol=1e-5)

    # 4) opt-in bf16 writeback (loose tolerance: only the final store is bf16).
    out4 = jax.block_until_ready(
        learnable_fourier_pe(x2, wr_weight, out_dtype=jnp.bfloat16))
    assert out4.dtype == jnp.bfloat16
    np.testing.assert_allclose(np.asarray(out4.astype(jnp.float32)),
                               np.asarray(ref2), rtol=0, atol=2e-2)

    print("KERNEL_OK")
</pallas_src>

<mosaic_0001>
module attributes {stable_mosaic.version = 11 : i64} {
  func.func @_fourier_pe_dedup_kernel(%arg0: i32, %arg1: memref<8x32xf32, #tpu.memory_space<vmem>>, %arg2: memref<32x128xf32, #tpu.memory_space<vmem>>, %arg3: memref<128x256xf32, #tpu.memory_space<vmem>>, %arg4: memref<2x8x256xf32, #tpu.memory_space<vmem>>) attributes {dimension_semantics = [#tpu.dimension_semantics<parallel>], iteration_bounds = array<i64: 1>, scalar_prefetch = 0 : i64, scratch_operands = 0 : i64, tpu.core_type = #tpu.core_type<tc>, window_params = [{transform_indices = @transform_0, window_bounds = array<i64: 8, 32>}, {pipeline_mode = #tpu.pipeline_mode<synchronous>, transform_indices = @transform_1, window_bounds = array<i64: 32, 128>}, {pipeline_mode = #tpu.pipeline_mode<synchronous>, transform_indices = @transform_2, window_bounds = array<i64: 128, 256>}, {transform_indices = @transform_3, window_bounds = array<i64: 2, 8, 256>}]} {
    %c0 = arith.constant 0 : index
    %c0_0 = arith.constant 0 : index
    %0 = vector.load %arg1[%c0, %c0_0] : memref<8x32xf32, #tpu.memory_space<vmem>>, vector<8x32xf32>
    %c0_1 = arith.constant 0 : index
    %c0_2 = arith.constant 0 : index
    %1 = vector.load %arg2[%c0_1, %c0_2] : memref<32x128xf32, #tpu.memory_space<vmem>>, vector<32x128xf32>
    %cst = arith.constant dense<0.000000e+00> : vector<8x128xf32>
    %2 = tpu.matmul %0, %1, %cst {dimension_numbers = #tpu.dot_dimension_numbers<[1], [0], [0], [1], [0, 0, 1, 1], [], []>} : vector<8x32xf32>, vector<32x128xf32>, vector<8x128xf32> -> vector<8x128xf32>
    %3 = math.cos %2 : vector<8x128xf32>
    %4 = math.sin %2 : vector<8x128xf32>
    %c0_3 = arith.constant 0 : index
    %c0_4 = arith.constant 0 : index
    %5 = vector.load %arg3[%c0_3, %c0_4] : memref<128x256xf32, #tpu.memory_space<vmem>>, vector<128x256xf32>
    %cst_5 = arith.constant dense<0.000000e+00> : vector<8x256xf32>
    %6 = tpu.matmul %3, %5, %cst_5 {dimension_numbers = #tpu.dot_dimension_numbers<[1], [0], [0], [1], [0, 0, 1, 1], [], []>} : vector<8x128xf32>, vector<128x256xf32>, vector<8x256xf32> -> vector<8x256xf32>
    %c0_6 = arith.constant 0 : index
    %c0_7 = arith.constant 0 : index
    %c0_8 = arith.constant 0 : index
    %7 = vector.load %arg4[%c0_6, %c0_7, %c0_8] : memref<2x8x256xf32, #tpu.memory_space<vmem>>, vector<1x8x256xf32>
    %8 = vector.shape_cast %7 : vector<1x8x256xf32> to vector<8x256xf32>
    %9 = vector.shape_cast %6 : vector<8x256xf32> to vector<1x8x256xf32>
    tpu.vector_store %arg4[%c0_6, %c0_7, %c0_8], %9 {strides = array<i32>} : memref<2x8x256xf32, #tpu.memory_space<vmem>>, vector<1x8x256xf32>,
    %cst_9 = arith.constant dense<0.000000e+00> : vector<8x256xf32>
    %10 = tpu.matmul %4, %5, %cst_9 {dimension_numbers = #tpu.dot_dimension_numbers<[1], [0], [0], [1], [0, 0, 1, 1], [], []>} : vector<8x128xf32>, vector<128x256xf32>, vector<8x256xf32> -> vector<8x256xf32>
    %c1 = arith.constant 1 : index
    %c0_10 = arith.constant 0 : index
    %c0_11 = arith.constant 0 : index
    %11 = vector.load %arg4[%c1, %c0_10, %c0_11] : memref<2x8x256xf32, #tpu.memory_space<vmem>>, vector<1x8x256xf32>
    %12 = vector.shape_cast %11 : vector<1x8x256xf32> to vector<8x256xf32>
    %13 = vector.shape_cast %10 : vector<8x256xf32> to vector<1x8x256xf32>
    tpu.vector_store %arg4[%c1, %c0_10, %c0_11], %13 {strides = array<i32>} : memref<2x8x256xf32, #tpu.memory_space<vmem>>, vector<1x8x256xf32>,
    return
  }
  func.func @transform_0(%arg0: i32) -> (i32, i32) {
    %c0_i32 = arith.constant 0 : i32
    %c0_i32_0 = arith.constant 0 : i32
    return %arg0, %c0_i32 : i32, i32
  }
  func.func @transform_1(%arg0: i32) -> (i32, i32) {
    %c0_i32 = arith.constant 0 : i32
    %c0_i32_0 = arith.constant 0 : i32
    %c0_i32_1 = arith.constant 0 : i32
    return %c0_i32, %c0_i32_0 : i32, i32
  }
  func.func @transform_2(%arg0: i32) -> (i32, i32) {
    %c0_i32 = arith.constant 0 : i32
    %c0_i32_0 = arith.constant 0 : i32
    %c0_i32_1 = arith.constant 0 : i32
    return %c0_i32, %c0_i32_0 : i32, i32
  }
  func.func @transform_3(%arg0: i32) -> (i32, i32, i32) {
    %c0_i32 = arith.constant 0 : i32
    %c0_i32_0 = arith.constant 0 : i32
    %c0_i32_1 = arith.constant 0 : i32
    return %c0_i32, %arg0, %c0_i32_0 : i32, i32, i32
  }
}

</mosaic_0001>

<bundles_post_ra>
// kernel: tpu_custom_call.1
= control target key start
LH: loop header
LB: loop body
LE: loop exit
PB: predicated region body
PF: predicated region fallthrough
CT: control target
= control target key end

     0   :  { %8 = vsyncpa [#allocation3], 0  ;;  %s781_s0 = inlined_call_operand.hbm [shape: f32[8,32], index: 0, kind: input, shape index: {}]   ;;  %s782_s1 = inlined_call_operand.hbm [shape: f32[32,128], index: 1, kind: input, shape index: {}]   ;;  %s783_s2 = inlined_call_operand.hbm [shape: f32[128,256], index: 2, kind: input, shape index: {}]   ;;  %s784_s3 = inlined_call_operand.hbm [shape: f32[2,8,256], index: 3, kind: output, shape index: {}]  }
   0x1   :  { %9 = vsyncpa [#allocation6], 0  ;;  %s26_s14 = sshll.u32 %s782_s1, 4  ;;  %s27_s14 = int_to_ptr.hbm [resolvable:$true] %s26_s14 }
   0x2   :  { %10 = vsyncpa [#allocation4], 0  ;;  %s659_s15 = smov [#allocation5]   ;;  %s16_s19 = sshll.u32 %s781_s0, 4  ;;  %s17_s19 = int_to_ptr.hbm [resolvable:$true] %s16_s19 }
   0x3   :  { %s28_s16 = sshll.u32 %s659_s15, 4  ;;  %s660_s20 = smov 128   ;;  %s29_s16 = int_to_ptr.vmem [resolvable:$true] %s28_s16 }
   0x4   :  { %s661_s21 = smov 8   ;;  %s662_s22 = smov [#allocation2]  }
   0x5   :  { %34 = dma.hbm_to_vmem [thread:$0]  %s27_s14, 512, %s29_s16, [#allocation6], %s660_s20, %s660_s20, %s661_s21  }
   0x6   :  { %s18_s23 = sshll.u32 %s662_s22, 4  ;;  %s39_s26 = sshll.u32 %s783_s2, 4  ;;  %s19_s23 = int_to_ptr.vmem [resolvable:$true] %s18_s23  ;;  %s40_s26 = int_to_ptr.hbm [resolvable:$true] %s39_s26 }
   0x7   :  { %21 = dma.hbm_to_vmem [thread:$0]  %s17_s19, 128, %s19_s23, [#allocation3]  }
   0x8   :  { %s663_s1 = smov [#allocation7]   ;;  %s664_s28 = smov 256  }
   0x9   :  { %s41_s27 = sshll.u32 %s663_s1, 4  ;;  %s665_s29 = smov 16   ;;  %s42_s27 = int_to_ptr.vmem [resolvable:$true] %s41_s27 }
   0xa   :  { %47 = dma.hbm_to_vmem [thread:$0]  %s40_s26, 4096, %s42_s27, [#allocation6], %s664_s28, %s664_s28, %s665_s29  }
   0xb   :  { %653 = dma.done.wait [#allocation3], 128  }
   0xc   :  { %654 = vsyncadd [#allocation3], 4294967168 }
   0xd   :  { %655 = dma.done.wait [#allocation6], 4608  }
   0xe   :  { %656 = vsyncadd [#allocation6], 4294962688  ;;  %v64_v0 = vld [vmem:[#allocation5 + $0x18] sm:$0xff]  ;;  %v63_v1 = vld [vmem:[#allocation5 + $0x10] sm:$0xff]  ;;  %vm65_vm0 = vcmask 261120   ;;  %s673_s0 = smov [#allocation8]  }
   0xf   :  { %81 = vmatpush.msra.mxu0 %v64_v0  ;;  %v62_v2 = vld [vmem:[#allocation5 + $0x8] sm:$0xff]  ;;  %v61_v3 = vld [vmem:[#allocation5] sm:$0xff]  ;;  %v60_v4 = vld [vmem:[#allocation2] sm:$0xff]  ;;  %v666_v17 = vmov 683565275   ;;  %s519_s2 = sshll.u32 %s673_s0, 4  ;;  %s520_s2 = int_to_ptr.vmem [resolvable:$true] %s519_s2 }
  0x10   :  { %v667_v19 = vmov 2475754826   ;;  %v668_v22 = vmov 2131351028   ;;  %v669_v25 = vmov 2102212464  }
  0x11   :  { %82 = vmatpush.msra.mxu0 %v63_v1  ;;  %v670_v28 = vmov 920167782   ;;  %v671_v31 = vmov 1326507024   ;;  %v672_v1 = vmov 0   ;;  %s521_s5 = sshll.u32 %s784_s3, 4  ;;  %s522_s5 = int_to_ptr.hbm [resolvable:$true] %s521_s5 }
  0x13   :  { %83 = vmatpush.msra.mxu0 %v62_v2 }
  0x15   :  { %84 = vmatpush.msra.mxu0 %v61_v3 }
  0x16   :  { %535 = vmatmul.msk.f32.vlgmr.msra.gmra.mxu0 %vm65_vm0, %v60_v4 }
  0x93   :  { %v706_v5 = vpop.f32.mrf.mxu0 }
  0x94   :  { %v92_v6 = vand.u32 2139095040, %v706_v5  ;;  %v89_v9 = vand.u32 2147483647, %v706_v5  ;;  %vm91_vm13 = vcmp.lt.s32.totalorder %v706_v5, 0 }
  0x96   :  { %v93_v7 = vshrl.u32 %v92_v6, 23  ;;  %v96_v11 = vand.u32 8388607, %v89_v9  ;;  %vm90_vm14 = vcmp.le.f32.partialorder %v89_v9, 0.7853982 }
  0x98   :  { %v536_v8 = vadd.s32 4294967169, %v93_v7  ;;  %v97_v15 = vor.u32 8388608, %v96_v11 }
  0x9a   :  { %v99_v10 = vadd.s32 1, %v536_v8  ;;  %v723_v38 = vshll.u32 %v97_v15, 8 }
  0x9c   :  { %vm100_vm1 = vcmp.gt.s32.totalorder %v99_v10, 0  ;;  %v138_v47 = vand.u32 65535, %v723_v38  ;;  %v139_v48 = vshrl.u32 %v723_v38, 16 }
  0x9d   :  { %v101_v12 = vsel %vm100_vm1, %v99_v10, 0 }
  0x9e   :  { %v103_v13 = vand.u32 31, %v101_v12  ;;  %v714_v16 = vshrl.u32 %v101_v12, 5 }
  0xa0   :  { %v712_v14 = vsub.s32 32, %v103_v13  ;;  %v106_v18 = vshll.u32 %v666_v17, %v103_v13  ;;  %v109_v20 = vshll.u32 %v667_v19, %v103_v13  ;;  %v112_v24 = vshll.u32 %v668_v22, %v103_v13 }
  0xa1   :  { %v115_v27 = vshll.u32 %v669_v25, %v103_v13  ;;  %v118_v30 = vshll.u32 %v670_v28, %v103_v13  ;;  %vm121_vm2 = vcmp.lt.s32.totalorder %v714_v16, 1  ;;  %vm124_vm3 = vcmp.lt.s32.totalorder %v714_v16, 4 }
  0xa2   :  { %v107_v21 = vshrl.u32 %v667_v19, %v712_v14  ;;  %v110_v23 = vshrl.u32 %v668_v22, %v712_v14  ;;  %v113_v26 = vshrl.u32 %v669_v25, %v712_v14  ;;  %v116_v29 = vshrl.u32 %v670_v28, %v712_v14  ;;  %v429_v28 = vld [vmem:[#allocation7 + $0xf8] sm:$0xff] }
  0xa3   :  { %v119_v32 = vshrl.u32 %v671_v31, %v712_v14  ;;  %vm123_vm4 = vcmp.lt.s32.totalorder %v714_v16, 3  ;;  %vm122_vm5 = vcmp.lt.s32.totalorder %v714_v16, 2  ;;  %v105_v12 = vshrl.u32 %v666_v17, %v712_v14  ;;  %450 = vmatpush.msra.mxu2 %v429_v28  ;;  %492 = vmatpush.msrb.mxu0 %v429_v28  ;;  %v426_v31 = vld [vmem:[#allocation7 + $0xe0] sm:$0xff] }
  0xa4   :  { %v108_v33 = vor.u32 %v107_v21, %v106_v18  ;;  %v111_v34 = vor.u32 %v110_v23, %v109_v20  ;;  %v114_v35 = vor.u32 %v113_v26, %v112_v24  ;;  %v117_v36 = vor.u32 %v116_v29, %v115_v27  ;;  %v428_v27 = vld [vmem:[#allocation7 + $0xf0] sm:$0xff] }
  0xa5   :  { %v120_v37 = vor.u32 %v119_v32, %v118_v30  ;;  %430 = vmatpush.msra.mxu1 %v428_v27  ;;  %472 = vmatpush.msra.mxu3 %v428_v27  ;;  %v427_v32 = vld [vmem:[#allocation7 + $0xe8] sm:$0xff] }
  0xa6   :  { %v129_v39 = vsel %vm121_vm2, %v108_v33, %v111_v34  ;;  %v133_v40 = vsel %vm121_vm2, %v111_v34, %v114_v35  ;;  %v130_v41 = vsel %vm124_vm3, %v117_v36, 920167782  ;;  %v126_v8 = vsel %vm124_vm3, %v114_v35, 2102212464  ;;  %451 = vmatpush.msra.mxu2 %v427_v32  ;;  %493 = vmatpush.msrb.mxu0 %v427_v32 }
  0xa7   :  { %v134_v42 = vsel %vm124_vm3, %v120_v37, 1326507024  ;;  %v131_v43 = vsel %vm123_vm4, %v114_v35, %v130_v41  ;;  %v125_v21 = vsel %vm121_vm2, %v105_v12, %v108_v33  ;;  %v127_v22 = vsel %vm123_vm4, %v111_v34, %v126_v8  ;;  %431 = vmatpush.msra.mxu1 %v426_v31  ;;  %473 = vmatpush.msra.mxu3 %v426_v31  ;;  %v424_v34 = vld [vmem:[#allocation7 + $0xd0] sm:$0xff]  ;;  %v425_v35 = vld [vmem:[#allocation7 + $0xd8] sm:$0xff]  ;;  %v422_v37 = vld [vmem:[#allocation7 + $0xc0] sm:$0xff] }
  0xa8   :  { %v135_v44 = vsel %vm123_vm4, %v117_v36, %v134_v42  ;;  %v132_v45 = vsel %vm122_vm5, %v129_v39, %v131_v43  ;;  %v128_v17 = vsel %vm122_vm5, %v125_v21, %v127_v22  ;;  %452 = vmatpush.msra.mxu2 %v425_v35  ;;  %494 = vmatpush.msrb.mxu0 %v425_v35  ;;  %v423_v39 = vld [vmem:[#allocation7 + $0xc8] sm:$0xff]  ;;  %v420_v41 = vld [vmem:[#allocation7 + $0xb0] sm:$0xff]  ;;  %v421_v42 = vld [vmem:[#allocation7 + $0xb8] sm:$0xff] }
  0xa9   :  { %v136_v46 = vsel %vm122_vm5, %v133_v40, %v135_v44  ;;  %v162_v51 = vand.u32 65535, %v132_v45  ;;  %v163_v52 = vshrl.u32 %v132_v45, 16  ;;  %v182_v36 = vmul.u32 %v723_v38, %v128_v17  ;;  %432 = vmatpush.msra.mxu1 %v424_v34  ;;  %474 = vmatpush.msra.mxu3 %v424_v34  ;;  %v418_v38 = vld [vmem:[#allocation7 + $0xa0] sm:$0xff]  ;;  %v419_v44 = vld [vmem:[#allocation7 + $0xa8] sm:$0xff]  ;;  %v416_v45 = vld [vmem:[#allocation7 + $0x90] sm:$0xff] }
  0xaa   :  { %v140_v49 = vand.u32 65535, %v136_v46  ;;  %v141_v50 = vshrl.u32 %v136_v46, 16  ;;  %453 = vmatpush.msra.mxu2 %v423_v39  ;;  %495 = vmatpush.msrb.mxu0 %v423_v39  ;;  %vm232_vm5 = vweird.f32 %v706_v5 }
  0xab   :  { %v165_v55 = vmul.u32 %v163_v52, %v138_v47  ;;  %v166_v56 = vmul.u32 %v162_v51, %v139_v48  ;;  %v164_v60 = vmul.u32 %v162_v51, %v138_v47  ;;  %v167_v0 = vmul.u32 %v163_v52, %v139_v48  ;;  %433 = vmatpush.msra.mxu1 %v422_v37  ;;  %v412_v51 = vld [vmem:[#allocation7 + $0x70] sm:$0xff]  ;;  %v413_v52 = vld [vmem:[#allocation7 + $0x78] sm:$0xff] }
  0xac   :  { %v143_v53 = vmul.u32 %v141_v50, %v138_v47  ;;  %v144_v54 = vmul.u32 %v140_v49, %v139_v48  ;;  %v142_v57 = vmul.u32 %v140_v49, %v138_v47  ;;  %v145_v59 = vmul.u32 %v141_v50, %v139_v48  ;;  %475 = vmatpush.msra.mxu3 %v422_v37  ;;  %v417_v47 = vld [vmem:[#allocation7 + $0x98] sm:$0xff]  ;;  %v414_v48 = vld [vmem:[#allocation7 + $0x80] sm:$0xff]  ;;  %v415_v49 = vld [vmem:[#allocation7 + $0x88] sm:$0xff] }
  0xad   :  { %v168_v61 = vshll.u32 %v165_v55, 16  ;;  %v170_v3 = vshll.u32 %v166_v56, 16  ;;  %v169_v19 = vshrl.u32 %v165_v55, 16  ;;  %v171_v25 = vshrl.u32 %v166_v56, 16  ;;  %434 = vmatpush.msra.mxu1 %v420_v41  ;;  %454 = vmatpush.msra.mxu2 %v421_v42  ;;  %v411_v55 = vld [vmem:[#allocation7 + $0x68] sm:$0xff] }
  0xae   :  { %v146_v58 = vshll.u32 %v143_v53, 16  ;;  %v148_v62 = vshll.u32 %v144_v54, 16  ;;  %v147_v13 = vshrl.u32 %v143_v53, 16  ;;  %v149_v23 = vshrl.u32 %v144_v54, 16  ;;  %476 = vmatpush.msra.mxu3 %v420_v41  ;;  %496 = vmatpush.msrb.mxu0 %v421_v42  ;;  %v410_v54 = vld [vmem:[#allocation7 + $0x60] sm:$0xff] }
  0xaf   :  { %vm172_vm7 = vc.u32 %v164_v60, %v168_v61  ;;  %v174_v4 = vadd.s32 %v168_v61, %v164_v60  ;;  %435 = vmatpush.msra.mxu1 %v418_v38  ;;  %455 = vmatpush.msra.mxu2 %v419_v44  ;;  %v406_v61 = vld [vmem:[#allocation7 + $0x40] sm:$0xff] }
  0xb0   :  { %vm150_vm6 = vc.u32 %v142_v57, %v146_v58  ;;  %v152_v63 = vadd.s32 %v146_v58, %v142_v57  ;;  %v173_v7 = vsel %vm172_vm7, 1, %v672_v1  ;;  %477 = vmatpush.msra.mxu3 %v418_v38  ;;  %497 = vmatpush.msrb.mxu0 %v419_v44  ;;  %v408_v57 = vld [vmem:[#allocation7 + $0x50] sm:$0xff]  ;;  %v409_v58 = vld [vmem:[#allocation7 + $0x58] sm:$0xff] }
  0xb1   :  { %v151_v2 = vsel %vm150_vm6, 1, %v672_v1  ;;  %v175_v11 = vadd.s32 %v173_v7, %v167_v0  ;;  %vm176_vm9 = vc.u32 %v174_v4, %v170_v3  ;;  %v756_v14 = vadd.s32 %v174_v4, %v170_v3  ;;  %436 = vmatpush.msra.mxu1 %v416_v45  ;;  %456 = vmatpush.msra.mxu2 %v417_v47  ;;  %v404_v0 = vld [vmem:[#allocation7 + $0x30] sm:$0xff]  ;;  %v403_v3 = vld [vmem:[#allocation7 + $0x28] sm:$0xff] }
  0xb2   :  { %v153_v6 = vadd.s32 %v151_v2, %v145_v59  ;;  %vm154_vm8 = vc.u32 %v152_v63, %v148_v62  ;;  %v177_v18 = vsel %vm176_vm9, 1, %v672_v1  ;;  %478 = vmatpush.msra.mxu3 %v416_v45  ;;  %498 = vmatpush.msrb.mxu0 %v417_v47  ;;  %v407_v62 = vld [vmem:[#allocation7 + $0x48] sm:$0xff]  ;;  %v402_v2 = vld [vmem:[#allocation7 + $0x20] sm:$0xff] }
  0xb3   :  { %v155_v10 = vsel %vm154_vm8, 1, %v672_v1  ;;  %v179_v20 = vadd.s32 %v177_v18, %v175_v11  ;;  %437 = vmatpush.msra.mxu1 %v414_v48  ;;  %457 = vmatpush.msra.mxu2 %v415_v49  ;;  %v405_v1 = vld [vmem:[#allocation7 + $0x38] sm:$0xff]  ;;  %v398_v18 = vld [vmem:[#allocation7] sm:$0xff] }
  0xb4   :  { %v157_v15 = vadd.s32 %v155_v10, %v153_v6  ;;  %479 = vmatpush.msra.mxu3 %v414_v48  ;;  %499 = vmatpush.msrb.mxu0 %v415_v49  ;;  %v400_v10 = vld [vmem:[#allocation7 + $0x10] sm:$0xff]  ;;  %v401_v11 = vld [vmem:[#allocation7 + $0x18] sm:$0xff] }
  0xb5   :  { %v180_v26 = vadd.s32 %v179_v20, %v169_v19  ;;  %438 = vmatpush.msra.mxu1 %v412_v51  ;;  %458 = vmatpush.msra.mxu2 %v413_v52  ;;  %v399_v19 = vld [vmem:[#allocation7 + $0x8] sm:$0xff] }
  0xb6   :  { %v158_v24 = vadd.s32 %v157_v15, %v147_v13  ;;  %480 = vmatpush.msra.mxu3 %v412_v51  ;;  %500 = vmatpush.msrb.mxu0 %v413_v52 }
  0xb7   :  { %v181_v30 = vadd.s32 %v180_v26, %v171_v25  ;;  %439 = vmatpush.msra.mxu1 %v410_v54  ;;  %459 = vmatpush.msra.mxu2 %v411_v55 }
  0xb8   :  { %v754_v29 = vadd.s32 %v158_v24, %v149_v23  ;;  %481 = vmatpush.msra.mxu3 %v410_v54  ;;  %501 = vmatpush.msrb.mxu0 %v411_v55 }
  0xb9   :  { %v185_v33 = vadd.s32 1, %v181_v30  ;;  %440 = vmatpush.msra.mxu1 %v408_v57  ;;  %460 = vmatpush.msra.mxu2 %v409_v58 }
  0xba   :  { %vm184_vm10 = vc.u32 %v754_v29, %v756_v14  ;;  %482 = vmatpush.msra.mxu3 %v408_v57  ;;  %502 = vmatpush.msrb.mxu0 %v409_v58  ;;  %v183_v6 = vadd.s32 %v756_v14, %v754_v29 }
  0xbb   :  { %v186_v16 = vsel %vm184_vm10, %v185_v33, %v181_v30  ;;  %441 = vmatpush.msra.mxu1 %v406_v61  ;;  %461 = vmatpush.msra.mxu2 %v407_v62 }
  0xbc   :  { %v187_v40 = vadd.s32 %v186_v16, %v182_v36  ;;  %483 = vmatpush.msra.mxu3 %v406_v61  ;;  %503 = vmatpush.msrb.mxu0 %v407_v62 }
  0xbd   :  { %442 = vmatpush.msra.mxu1 %v404_v0  ;;  %462 = vmatpush.msra.mxu2 %v405_v1 }
  0xbe   :  { %v188_v43 = vadd.s32 536870912, %v187_v40  ;;  %484 = vmatpush.msra.mxu3 %v404_v0  ;;  %504 = vmatpush.msrb.mxu0 %v405_v1 }
  0xbf   :  { %443 = vmatpush.msra.mxu1 %v402_v2  ;;  %463 = vmatpush.msra.mxu2 %v403_v3 }
  0xc0   :  { %v763_v46 = vshrl.u32 %v188_v43, 30  ;;  %485 = vmatpush.msra.mxu3 %v402_v2  ;;  %505 = vmatpush.msrb.mxu0 %v403_v3 }
  0xc1   :  { %444 = vmatpush.msra.mxu1 %v400_v10  ;;  %464 = vmatpush.msra.mxu2 %v401_v11 }
  0xc2   :  { %v190_v50 = vshll.u32 %v763_v46, 30  ;;  %486 = vmatpush.msra.mxu3 %v400_v10  ;;  %506 = vmatpush.msrb.mxu0 %v401_v11  ;;  %v213_v29 = vsub.s32 4, %v763_v46 }
  0xc3   :  { %445 = vmatpush.msra.mxu1 %v398_v18  ;;  %465 = vmatpush.msra.mxu2 %v399_v19 }
  0xc4   :  { %v191_v53 = vsub.s32 %v187_v40, %v190_v50  ;;  %487 = vmatpush.msra.mxu3 %v398_v18  ;;  %507 = vmatpush.msrb.mxu0 %v399_v19  ;;  %v214_v31 = vsel %vm91_vm13, %v213_v29, %v763_v46 }
  0xc5   :  { %v216_v34 = vsel %vm90_vm14, 0, %v214_v31 }
  0xc6   :  { %vm192_vm11 = vcmp.lt.s32.totalorder %v191_v53, 0  ;;  %v193_v56 = vsub.s32 0, %v191_v53  ;;  %v387_v39 = vadd.s32 3, %v216_v34  ;;  %v233_v43 = vand.u32 3, %v216_v34 }
  0xc8   :  { %v194_v59 = vsel %vm192_vm11, %v193_v56, %v191_v53  ;;  %v388_v38 = vand.u32 3, %v387_v39  ;;  %vm234_vm15 = vcmp.lt.s32.totalorder %v233_v43, 2  ;;  %vm235_vm0 = vcmp.eq.s32.totalorder %v233_v43, 0 }
  0xc9   :  { %v195_v60 = vclz %v194_v59  ;;  %vm238_vm1 = vcmp.eq.s32.totalorder %v233_v43, 2 }
  0xca   :  { %vm389_vm2 = vcmp.lt.s32.totalorder %v388_v38, 2  ;;  %vm390_vm3 = vcmp.eq.s32.totalorder %v388_v38, 0  ;;  %vm393_vm4 = vcmp.eq.s32.totalorder %v388_v38, 2 }
  0xcb   :  { %v537_v63 = vadd.s32 4294967294, %v195_v60 }
  0xcd   :  { %vm538_vm12 = vcmp.lt.s32.totalorder %v537_v63, 0 }
  0xce   :  { %v198_v4 = vsel %vm538_vm12, 0, %v537_v63 }
  0xcf   :  { %v199_v7 = vsub.s32 32, %v198_v4  ;;  %v203_v8 = vsub.s32 4294967266, %v198_v4  ;;  %v200_v12 = vshll.u32 %v191_v53, %v198_v4 }
  0xd1   :  { %v201_v13 = vshrl.u32 %v183_v6, %v199_v7  ;;  %v204_v15 = vadd.s32 127, %v203_v8 }
  0xd3   :  { %v202_v20 = vor.u32 %v201_v13, %v200_v12  ;;  %v205_v21 = vshll.u32 %v204_v15, 23 }
  0xd5   :  { %v206_v22 = vor.u32 4788187, %v205_v21  ;;  %v209_v24 = vcvt.s32.f32 %v202_v20 }
  0xd7   :  { %v207_v23 = vand.u32 2147483647, %v206_v22 }
  0xd9   :  { %v210_v25 = vmul.f32 %v209_v24, %v207_v23 }
  0xdb   :  { %v211_v26 = vxor.u32 2147483648, %v210_v25 }
  0xdd   :  { %v212_v27 = vsel %vm91_vm13, %v211_v26, %v210_v25 }
  0xde   :  { %v215_v28 = vsel %vm90_vm14, %v706_v5, %v212_v27 }
  0xdf   :  { %v217_v14 = vmul.f32 %v215_v28, %v215_v28 }
  0xe1   :  { %v218_v17 = vmul.f32 -0.001358992, %v217_v14  ;;  %v225_v30 = vmul.f32 -0.00019511016, %v217_v14 }
  0xe3   :  { %v219_v32 = vadd.f32 0.041655596, %v218_v17  ;;  %v226_v33 = vadd.f32 0.008332121, %v225_v30 }
  0xe5   :  { %v220_v35 = vmul.f32 %v219_v32, %v217_v14  ;;  %v227_v36 = vmul.f32 %v226_v33, %v217_v14 }
  0xe7   :  { %v221_v16 = vadd.f32 -0.4999988, %v220_v35  ;;  %v228_v37 = vadd.f32 -0.16666654, %v227_v36 }
  0xe9   :  { %v222_v40 = vmul.f32 %v221_v16, %v217_v14  ;;  %v229_v9 = vmul.f32 %v228_v37, %v217_v14 }
  0xeb   :  { %v223_v41 = vadd.f32 1.0, %v222_v40  ;;  %v230_v42 = vadd.f32 1.0, %v229_v9 }
  0xed   :  { %v231_v44 = vmul.f32 %v230_v42, %v215_v28  ;;  %v239_v45 = vxor.u32 2147483648, %v223_v41 }
  0xef   :  { %v236_v47 = vxor.u32 2147483648, %v231_v44  ;;  %v240_v48 = vsel %vm238_vm1, %v239_v45, %v231_v44  ;;  %v395_v50 = vsel %vm393_vm4, %v239_v45, %v231_v44 }
  0xf1   :  { %v237_v46 = vsel %vm235_vm0, %v223_v41, %v236_v47  ;;  %v392_v49 = vsel %vm390_vm3, %v223_v41, %v236_v47 }
  0xf2   :  { %v241_v51 = vsel %vm234_vm15, %v237_v46, %v240_v48  ;;  %v396_v52 = vsel %vm389_vm2, %v392_v49, %v395_v50 }
  0xf3   :  { %v242_v53 = vsel %vm232_vm5, nan, %v241_v51  ;;  %v397_v54 = vsel %vm232_vm5, nan, %v396_v52 }
  0xf4   :  { %446 = vmatmul.f32.vlgmr.msra.gmra.mxu1 %v242_v53  ;;  %466 = vmatmul.f32.vlgmr.msra.gmra.mxu2 %v242_v53 }
  0xf5   :  { %488 = vmatmul.f32.vlgmr.msra.gmra.mxu3 %v397_v54  ;;  %508 = vmatmul.f32.vlgmr.msrb.gmra.mxu0 %v397_v54 }
 0x171   :  { %v447_v55 = vpop.f32.mrf.mxu1 }
 0x172   :  { %470 = vst [vmem:[#allocation8] sm:$0xff] %v447_v55  ;;  %v509_v56 = vpop.f32.mrf.mxu0 }
 0x173   :  { %514 = vst [vmem:[#allocation8 + $0x18] sm:$0xff] %v509_v56 }
 0x177   :  { %v467_v57 = vpop.f32.mrf.mxu2 }
 0x178   :  { %471 = vst [vmem:[#allocation8 + $0x8] sm:$0xff] %v467_v57  ;;  %v489_v5 = vpop.f32.mrf.mxu3 }
 0x179   :  { %513 = vst [vmem:[#allocation8 + $0x10] sm:$0xff] %v489_v5 }
 0x17a   :  { %527 = dma.vmem_to_hbm [thread:$0]  %s520_s2, 512, %s522_s5, [#allocation4], %s664_s28, %s664_s28, %s665_s29  }
 0x17b   :  { %657 = dma.done.wait [#allocation4], 512  }
 0x17c   :  { %658 = vsyncadd [#allocation4], 4294966784 }
 0x17d   :  { %532 = vsyncpa [#allocation3], 1 }
 0x17e   :  { %533 = vsyncpa [#allocation6], 1 }
 0x17f   :  { %534 = vsyncpa [#allocation4], 1 }

</bundles_post_ra>
